<compile_context>
chip_gen: v6e
topology: v6e:2x2x1
jax: 0.10.0
libtpu: 0.0.40
codegen_flags: <defaults>
</compile_context>

<pallas_src>
import math

import jax
import jax.numpy as jnp
from jax.experimental import pallas as pl
from jax.experimental.pallas import tpu as pltpu

EPS = 1e-5  # PyTorch BatchNorm1d default


def _unimodal_kernel(xt_ref, xi_ref, w1_ref, w2_ref, bn_ref, o_ref):
    """Single step: both branches, combined lane-packed (B, 2P) output."""
    B = xt_ref.shape[0]
    P = w2_ref.shape[-1]
    inv_b = 1.0 / B

    # One (8, D) f32 slab holds all BN affine params:
    # rows: 0 g1_t, 1 b1_t, 2 g2_t (padded to D lanes), 3 b2_t, 4 g1_i, 5 b1_i, 6 g2_i, 7 b2_i
    bn = bn_ref[...]

    def branch(x_f32, w1, w2, g1, b1, g2, b2):
        # Linear(shared_dim -> shared_dim): bf16 operands on the MXU, f32 accumulation.
        h = jnp.dot(x_f32.astype(jnp.bfloat16), w1,
                    preferred_element_type=jnp.float32)                       # (B, D) f32

        # BatchNorm1d (training-mode batch stats), single reduction pass,
        # affine folded into two coefficients: h <- h*s + t.
        mu = jnp.sum(h, axis=0, keepdims=True) * inv_b
        var = jnp.maximum(jnp.sum(h * h, axis=0, keepdims=True) * inv_b - mu * mu, 0.0)
        s = g1 * jax.lax.rsqrt(var + EPS)
        t = b1 - mu * s
        h = jnp.maximum(h * s + t, 0.0)                                        # ReLU

        # Linear(shared_dim -> prime_dim).
        z = jnp.dot(h.astype(jnp.bfloat16), w2,
                    preferred_element_type=jnp.float32)                        # (B, P) f32

        # BatchNorm1d(prime_dim), same folded form.
        mu2 = jnp.sum(z, axis=0, keepdims=True) * inv_b
        var2 = jnp.maximum(jnp.sum(z * z, axis=0, keepdims=True) * inv_b - mu2 * mu2, 0.0)
        s2 = g2 * jax.lax.rsqrt(var2 + EPS)
        t2 = b2 - mu2 * s2
        return jnp.maximum(z * s2 + t2, 0.0)                                   # ReLU

    yt = branch(xt_ref[...], w1_ref[0], w2_ref[0],
                bn[0:1, :], bn[1:2, :], bn[2:3, :P], bn[3:4, :P])
    yi = branch(xi_ref[...], w1_ref[1], w2_ref[1],
                bn[4:5, :], bn[5:6, :], bn[6:7, :P], bn[7:8, :P])

    # Combined lane-packed output slab: text in lanes [0, P), image in lanes [P, 2P).
    o_ref[:, :P] = yt
    o_ref[:, P:] = yi


def unimodal_detection(text_encoding, image_encoding, params):
    """Runs both branches in a single grid-less pallas_call.

    Returns (text_prime, image_prime). `params` comes from init_params (pre-stacked once)."""
    w1, w2, bn = params
    B, _ = text_encoding.shape
    P = w2.shape[-1]

    vmem = pl.BlockSpec(memory_space=pltpu.MemorySpace.VMEM)  # whole array resident in VMEM
    out = pl.pallas_call(
        _unimodal_kernel,
        out_shape=jax.ShapeDtypeStruct((B, 2 * P), jnp.float32),
        in_specs=[vmem, vmem, vmem, vmem, vmem],
        out_specs=vmem,
    )(text_encoding, image_encoding, w1, w2, bn)

    return out[:, :P], out[:, P:]


def init_params(key, shared_dim=128, prime_dim=16):
    """Builds pre-stacked parameters ONCE (no per-call stacking on the dispatch path)."""
    kt1, kt2, ki1, ki2 = jax.random.split(key, 4)
    lim = 1.0 / math.sqrt(shared_dim)

    def lin_weight(k, d_in, d_out):
        # Stored transposed as (in, out); bf16 operands for the MXU, f32 accumulation in-kernel.
        return jax.random.uniform(k, (d_in, d_out), jnp.float32, -lim, lim).astype(jnp.bfloat16)

    # axis 0 = [text, image]
    w1 = jnp.stack([lin_weight(kt1, shared_dim, shared_dim),
                    lin_weight(ki1, shared_dim, shared_dim)], axis=0)   # (2, D, D) bf16
    w2 = jnp.stack([lin_weight(kt2, shared_dim, prime_dim),
                    lin_weight(ki2, shared_dim, prime_dim)], axis=0)    # (2, D, P) bf16

    # All BN affine params packed into one (8, D) f32 slab -> a single parameter DMA.
    # rows: 0 g1_t, 1 b1_t, 2 g2_t(pad), 3 b2_t(pad), 4 g1_i, 5 b1_i, 6 g2_i(pad), 7 b2_i(pad)
    bn = jnp.zeros((8, shared_dim), jnp.float32)
    bn = bn.at[0, :].set(1.0).at[4, :].set(1.0)                      # gamma1 = 1 (default)
    bn = bn.at[2, :prime_dim].set(1.0).at[6, :prime_dim].set(1.0)    # gamma2 = 1 (default)
    # beta rows (1, 3, 5, 7) remain 0 (PyTorch default)
    return (w1, w2, bn)


if __name__ == "__main__":
    shared_dim = 128
    prime_dim = 16
    batch = 8  # BatchNorm1d in training mode needs batch > 1

    root = jax.random.PRNGKey(0)
    k_params, k_text, k_img = jax.random.split(root, 3)

    params = init_params(k_params, shared_dim, prime_dim)
    text_encoding = jax.random.normal(k_text, (batch, shared_dim), jnp.float32)
    image_encoding = jax.random.normal(k_img, (batch, shared_dim), jnp.float32)

    text_prime, image_prime = unimodal_detection(text_encoding, image_encoding, params)
    jax.block_until_ready((text_prime, image_prime))

    assert text_prime.shape == (batch, prime_dim)
    assert image_prime.shape == (batch, prime_dim)
    assert text_prime.dtype == jnp.float32 and image_prime.dtype == jnp.float32
    print("KERNEL_OK")
</pallas_src>

<mosaic_0001>
module attributes {stable_mosaic.version = 11 : i64} {
  func.func @_unimodal_kernel(%arg0: memref<8x128xf32, #tpu.memory_space<vmem>>, %arg1: memref<8x128xf32, #tpu.memory_space<vmem>>, %arg2: memref<2x128x128xbf16, #tpu.memory_space<vmem>>, %arg3: memref<2x128x16xbf16, #tpu.memory_space<vmem>>, %arg4: memref<8x128xf32, #tpu.memory_space<vmem>>, %arg5: memref<8x32xf32, #tpu.memory_space<vmem>>) attributes {dimension_semantics = [], scalar_prefetch = 0 : i64, scratch_operands = 0 : i64, tpu.core_type = #tpu.core_type<tc>} {
    %c0 = arith.constant 0 : index
    %c0_0 = arith.constant 0 : index
    %0 = vector.load %arg4[%c0, %c0_0] : memref<8x128xf32, #tpu.memory_space<vmem>>, vector<8x128xf32>
    %c0_1 = arith.constant 0 : index
    %c0_2 = arith.constant 0 : index
    %1 = vector.load %arg0[%c0_1, %c0_2] : memref<8x128xf32, #tpu.memory_space<vmem>>, vector<8x128xf32>
    %c0_3 = arith.constant 0 : index
    %c0_4 = arith.constant 0 : index
    %c0_5 = arith.constant 0 : index
    %2 = vector.load %arg2[%c0_3, %c0_4, %c0_5] : memref<2x128x128xbf16, #tpu.memory_space<vmem>>, vector<1x128x128xbf16>
    %3 = vector.shape_cast %2 : vector<1x128x128xbf16> to vector<128x128xbf16>
    %c0_6 = arith.constant 0 : index
    %c0_7 = arith.constant 0 : index
    %c0_8 = arith.constant 0 : index
    %4 = vector.load %arg3[%c0_6, %c0_7, %c0_8] : memref<2x128x16xbf16, #tpu.memory_space<vmem>>, vector<1x128x16xbf16>
    %5 = vector.shape_cast %4 : vector<1x128x16xbf16> to vector<128x16xbf16>
    %6 = vector.extract_strided_slice %0 {offsets = [0, 0], sizes = [1, 128], strides = [1, 1]} : vector<8x128xf32> to vector<1x128xf32>
    %7 = vector.extract_strided_slice %0 {offsets = [1, 0], sizes = [1, 128], strides = [1, 1]} : vector<8x128xf32> to vector<1x128xf32>
    %8 = vector.extract_strided_slice %0 {offsets = [2, 0], sizes = [1, 16], strides = [1, 1]} : vector<8x128xf32> to vector<1x16xf32>
    %9 = vector.extract_strided_slice %0 {offsets = [3, 0], sizes = [1, 16], strides = [1, 1]} : vector<8x128xf32> to vector<1x16xf32>
    %10 = arith.truncf %1 : vector<8x128xf32> to vector<8x128xbf16>
    %cst = arith.constant dense<0.000000e+00> : vector<8x128xf32>
    %11 = tpu.matmul %10, %3, %cst {dimension_numbers = #tpu.dot_dimension_numbers<[1], [0], [0], [1], [0, 0, 1, 1], [], []>} : vector<8x128xbf16>, vector<128x128xbf16>, vector<8x128xf32> -> vector<8x128xf32>
    %cst_9 = arith.constant dense<0.000000e+00> : vector<128xf32>
    %12 = vector.multi_reduction <add>, %11, %cst_9 [0] : vector<8x128xf32> to vector<128xf32>
    %13 = vector.shape_cast %12 : vector<128xf32> to vector<1x128xf32>
    %cst_10 = arith.constant 1.250000e-01 : f32
    %14 = vector.broadcast %cst_10 : f32 to vector<1x128xf32>
    %15 = arith.mulf %13, %14 : vector<1x128xf32>
    %16 = arith.mulf %11, %11 : vector<8x128xf32>
    %cst_11 = arith.constant dense<0.000000e+00> : vector<128xf32>
    %17 = vector.multi_reduction <add>, %16, %cst_11 [0] : vector<8x128xf32> to vector<128xf32>
    %18 = vector.shape_cast %17 : vector<128xf32> to vector<1x128xf32>
    %cst_12 = arith.constant 1.250000e-01 : f32
    %19 = vector.broadcast %cst_12 : f32 to vector<1x128xf32>
    %20 = arith.mulf %18, %19 : vector<1x128xf32>
    %21 = arith.mulf %15, %15 : vector<1x128xf32>
    %22 = arith.subf %20, %21 : vector<1x128xf32>
    %cst_13 = arith.constant 0.000000e+00 : f32
    %23 = vector.broadcast %cst_13 : f32 to vector<1x128xf32>
    %24 = arith.maximumf %22, %23 : vector<1x128xf32>
    %cst_14 = arith.constant 9.99999974E-6 : f32
    %25 = vector.broadcast %cst_14 : f32 to vector<1x128xf32>
    %26 = arith.addf %24, %25 : vector<1x128xf32>
    %27 = math.rsqrt %26 : vector<1x128xf32>
    %28 = arith.mulf %6, %27 : vector<1x128xf32>
    %29 = arith.mulf %15, %28 : vector<1x128xf32>
    %30 = arith.subf %7, %29 : vector<1x128xf32>
    %31 = vector.broadcast %28 : vector<1x128xf32> to vector<8x128xf32>
    %32 = arith.mulf %11, %31 : vector<8x128xf32>
    %33 = vector.broadcast %30 : vector<1x128xf32> to vector<8x128xf32>
    %34 = arith.addf %32, %33 : vector<8x128xf32>
    %cst_15 = arith.constant 0.000000e+00 : f32
    %35 = vector.broadcast %cst_15 : f32 to vector<8x128xf32>
    %36 = arith.maximumf %34, %35 : vector<8x128xf32>
    %37 = arith.truncf %36 : vector<8x128xf32> to vector<8x128xbf16>
    %cst_16 = arith.constant dense<0.000000e+00> : vector<8x16xf32>
    %38 = tpu.matmul %37, %5, %cst_16 {dimension_numbers = #tpu.dot_dimension_numbers<[1], [0], [0], [1], [0, 0, 1, 1], [], []>} : vector<8x128xbf16>, vector<128x16xbf16>, vector<8x16xf32> -> vector<8x16xf32>
    %cst_17 = arith.constant dense<0.000000e+00> : vector<16xf32>
    %39 = vector.multi_reduction <add>, %38, %cst_17 [0] : vector<8x16xf32> to vector<16xf32>
    %40 = vector.shape_cast %39 : vector<16xf32> to vector<1x16xf32>
    %cst_18 = arith.constant 1.250000e-01 : f32
    %41 = vector.broadcast %cst_18 : f32 to vector<1x16xf32>
    %42 = arith.mulf %40, %41 : vector<1x16xf32>
    %43 = arith.mulf %38, %38 : vector<8x16xf32>
    %cst_19 = arith.constant dense<0.000000e+00> : vector<16xf32>
    %44 = vector.multi_reduction <add>, %43, %cst_19 [0] : vector<8x16xf32> to vector<16xf32>
    %45 = vector.shape_cast %44 : vector<16xf32> to vector<1x16xf32>
    %cst_20 = arith.constant 1.250000e-01 : f32
    %46 = vector.broadcast %cst_20 : f32 to vector<1x16xf32>
    %47 = arith.mulf %45, %46 : vector<1x16xf32>
    %48 = arith.mulf %42, %42 : vector<1x16xf32>
    %49 = arith.subf %47, %48 : vector<1x16xf32>
    %cst_21 = arith.constant 0.000000e+00 : f32
    %50 = vector.broadcast %cst_21 : f32 to vector<1x16xf32>
    %51 = arith.maximumf %49, %50 : vector<1x16xf32>
    %cst_22 = arith.constant 9.99999974E-6 : f32
    %52 = vector.broadcast %cst_22 : f32 to vector<1x16xf32>
    %53 = arith.addf %51, %52 : vector<1x16xf32>
    %54 = math.rsqrt %53 : vector<1x16xf32>
    %55 = arith.mulf %8, %54 : vector<1x16xf32>
    %56 = arith.mulf %42, %55 : vector<1x16xf32>
    %57 = arith.subf %9, %56 : vector<1x16xf32>
    %58 = vector.broadcast %55 : vector<1x16xf32> to vector<8x16xf32>
    %59 = arith.mulf %38, %58 : vector<8x16xf32>
    %60 = vector.broadcast %57 : vector<1x16xf32> to vector<8x16xf32>
    %61 = arith.addf %59, %60 : vector<8x16xf32>
    %cst_23 = arith.constant 0.000000e+00 : f32
    %62 = vector.broadcast %cst_23 : f32 to vector<8x16xf32>
    %63 = arith.maximumf %61, %62 : vector<8x16xf32>
    %c0_24 = arith.constant 0 : index
    %c0_25 = arith.constant 0 : index
    %64 = vector.load %arg1[%c0_24, %c0_25] : memref<8x128xf32, #tpu.memory_space<vmem>>, vector<8x128xf32>
    %c1 = arith.constant 1 : index
    %c0_26 = arith.constant 0 : index
    %c0_27 = arith.constant 0 : index
    %65 = vector.load %arg2[%c1, %c0_26, %c0_27] : memref<2x128x128xbf16, #tpu.memory_space<vmem>>, vector<1x128x128xbf16>
    %66 = vector.shape_cast %65 : vector<1x128x128xbf16> to vector<128x128xbf16>
    %c1_28 = arith.constant 1 : index
    %c0_29 = arith.constant 0 : index
    %c0_30 = arith.constant 0 : index
    %67 = vector.load %arg3[%c1_28, %c0_29, %c0_30] : memref<2x128x16xbf16, #tpu.memory_space<vmem>>, vector<1x128x16xbf16>
    %68 = vector.shape_cast %67 : vector<1x128x16xbf16> to vector<128x16xbf16>
    %69 = vector.extract_strided_slice %0 {offsets = [4, 0], sizes = [1, 128], strides = [1, 1]} : vector<8x128xf32> to vector<1x128xf32>
    %70 = vector.extract_strided_slice %0 {offsets = [5, 0], sizes = [1, 128], strides = [1, 1]} : vector<8x128xf32> to vector<1x128xf32>
    %71 = vector.extract_strided_slice %0 {offsets = [6, 0], sizes = [1, 16], strides = [1, 1]} : vector<8x128xf32> to vector<1x16xf32>
    %72 = vector.extract_strided_slice %0 {offsets = [7, 0], sizes = [1, 16], strides = [1, 1]} : vector<8x128xf32> to vector<1x16xf32>
    %73 = arith.truncf %64 : vector<8x128xf32> to vector<8x128xbf16>
    %cst_31 = arith.constant dense<0.000000e+00> : vector<8x128xf32>
    %74 = tpu.matmul %73, %66, %cst_31 {dimension_numbers = #tpu.dot_dimension_numbers<[1], [0], [0], [1], [0, 0, 1, 1], [], []>} : vector<8x128xbf16>, vector<128x128xbf16>, vector<8x128xf32> -> vector<8x128xf32>
    %cst_32 = arith.constant dense<0.000000e+00> : vector<128xf32>
    %75 = vector.multi_reduction <add>, %74, %cst_32 [0] : vector<8x128xf32> to vector<128xf32>
    %76 = vector.shape_cast %75 : vector<128xf32> to vector<1x128xf32>
    %cst_33 = arith.constant 1.250000e-01 : f32
    %77 = vector.broadcast %cst_33 : f32 to vector<1x128xf32>
    %78 = arith.mulf %76, %77 : vector<1x128xf32>
    %79 = arith.mulf %74, %74 : vector<8x128xf32>
    %cst_34 = arith.constant dense<0.000000e+00> : vector<128xf32>
    %80 = vector.multi_reduction <add>, %79, %cst_34 [0] : vector<8x128xf32> to vector<128xf32>
    %81 = vector.shape_cast %80 : vector<128xf32> to vector<1x128xf32>
    %cst_35 = arith.constant 1.250000e-01 : f32
    %82 = vector.broadcast %cst_35 : f32 to vector<1x128xf32>
    %83 = arith.mulf %81, %82 : vector<1x128xf32>
    %84 = arith.mulf %78, %78 : vector<1x128xf32>
    %85 = arith.subf %83, %84 : vector<1x128xf32>
    %cst_36 = arith.constant 0.000000e+00 : f32
    %86 = vector.broadcast %cst_36 : f32 to vector<1x128xf32>
    %87 = arith.maximumf %85, %86 : vector<1x128xf32>
    %cst_37 = arith.constant 9.99999974E-6 : f32
    %88 = vector.broadcast %cst_37 : f32 to vector<1x128xf32>
    %89 = arith.addf %87, %88 : vector<1x128xf32>
    %90 = math.rsqrt %89 : vector<1x128xf32>
    %91 = arith.mulf %69, %90 : vector<1x128xf32>
    %92 = arith.mulf %78, %91 : vector<1x128xf32>
    %93 = arith.subf %70, %92 : vector<1x128xf32>
    %94 = vector.broadcast %91 : vector<1x128xf32> to vector<8x128xf32>
    %95 = arith.mulf %74, %94 : vector<8x128xf32>
    %96 = vector.broadcast %93 : vector<1x128xf32> to vector<8x128xf32>
    %97 = arith.addf %95, %96 : vector<8x128xf32>
    %cst_38 = arith.constant 0.000000e+00 : f32
    %98 = vector.broadcast %cst_38 : f32 to vector<8x128xf32>
    %99 = arith.maximumf %97, %98 : vector<8x128xf32>
    %100 = arith.truncf %99 : vector<8x128xf32> to vector<8x128xbf16>
    %cst_39 = arith.constant dense<0.000000e+00> : vector<8x16xf32>
    %101 = tpu.matmul %100, %68, %cst_39 {dimension_numbers = #tpu.dot_dimension_numbers<[1], [0], [0], [1], [0, 0, 1, 1], [], []>} : vector<8x128xbf16>, vector<128x16xbf16>, vector<8x16xf32> -> vector<8x16xf32>
    %cst_40 = arith.constant dense<0.000000e+00> : vector<16xf32>
    %102 = vector.multi_reduction <add>, %101, %cst_40 [0] : vector<8x16xf32> to vector<16xf32>
    %103 = vector.shape_cast %102 : vector<16xf32> to vector<1x16xf32>
    %cst_41 = arith.constant 1.250000e-01 : f32
    %104 = vector.broadcast %cst_41 : f32 to vector<1x16xf32>
    %105 = arith.mulf %103, %104 : vector<1x16xf32>
    %106 = arith.mulf %101, %101 : vector<8x16xf32>
    %cst_42 = arith.constant dense<0.000000e+00> : vector<16xf32>
    %107 = vector.multi_reduction <add>, %106, %cst_42 [0] : vector<8x16xf32> to vector<16xf32>
    %108 = vector.shape_cast %107 : vector<16xf32> to vector<1x16xf32>
    %cst_43 = arith.constant 1.250000e-01 : f32
    %109 = vector.broadcast %cst_43 : f32 to vector<1x16xf32>
    %110 = arith.mulf %108, %109 : vector<1x16xf32>
    %111 = arith.mulf %105, %105 : vector<1x16xf32>
    %112 = arith.subf %110, %111 : vector<1x16xf32>
    %cst_44 = arith.constant 0.000000e+00 : f32
    %113 = vector.broadcast %cst_44 : f32 to vector<1x16xf32>
    %114 = arith.maximumf %112, %113 : vector<1x16xf32>
    %cst_45 = arith.constant 9.99999974E-6 : f32
    %115 = vector.broadcast %cst_45 : f32 to vector<1x16xf32>
    %116 = arith.addf %114, %115 : vector<1x16xf32>
    %117 = math.rsqrt %116 : vector<1x16xf32>
    %118 = arith.mulf %71, %117 : vector<1x16xf32>
    %119 = arith.mulf %105, %118 : vector<1x16xf32>
    %120 = arith.subf %72, %119 : vector<1x16xf32>
    %121 = vector.broadcast %118 : vector<1x16xf32> to vector<8x16xf32>
    %122 = arith.mulf %101, %121 : vector<8x16xf32>
    %123 = vector.broadcast %120 : vector<1x16xf32> to vector<8x16xf32>
    %124 = arith.addf %122, %123 : vector<8x16xf32>
    %cst_46 = arith.constant 0.000000e+00 : f32
    %125 = vector.broadcast %cst_46 : f32 to vector<8x16xf32>
    %126 = arith.maximumf %124, %125 : vector<8x16xf32>
    %c0_47 = arith.constant 0 : index
    %c0_48 = arith.constant 0 : index
    %127 = vector.load %arg5[%c0_47, %c0_48] : memref<8x32xf32, #tpu.memory_space<vmem>>, vector<8x16xf32>
    tpu.vector_store %arg5[%c0_47, %c0_48], %63 {strides = array<i32>} : memref<8x32xf32, #tpu.memory_space<vmem>>, vector<8x16xf32>,
    %c0_49 = arith.constant 0 : index
    %c16 = arith.constant 16 : index
    %128 = vector.load %arg5[%c0_49, %c16] : memref<8x32xf32, #tpu.memory_space<vmem>>, vector<8x16xf32>
    tpu.vector_store %arg5[%c0_49, %c16], %126 {strides = array<i32>} : memref<8x32xf32, #tpu.memory_space<vmem>>, vector<8x16xf32>,
    return
  }
}

</mosaic_0001>

<bundles_post_ra>
// kernel: tpu_custom_call.1
= control target key start
LH: loop header
LB: loop body
LE: loop exit
PB: predicated region body
PF: predicated region fallthrough
CT: control target
= control target key end

     0   :  { %10 = vsyncpa [#allocation3], 0  ;;  %s1118_s0 = inlined_call_operand.vmem [shape: f32[8,128], index: 0, kind: input, shape index: {}]   ;;  %s1119_s1 = inlined_call_operand.vmem [shape: f32[8,128], index: 1, kind: input, shape index: {}]   ;;  %s1120_s2 = inlined_call_operand.vmem [shape: bf16[2,128,128], index: 2, kind: input, shape index: {}]   ;;  %s1121_s3 = inlined_call_operand.vmem [shape: bf16[2,128,16], index: 3, kind: input, shape index: {}]   ;;  %s1122_s4 = inlined_call_operand.hbm [shape: f32[8,128], index: 4, kind: input, shape index: {}]   ;;  %s1123_s5 = inlined_call_operand.hbm [shape: f32[8,32], index: 5, kind: output, shape index: {}]  }
   0x1   :  { %11 = vsyncpa [#allocation4], 0  ;;  %s903_s18 = smov [#allocation2]  }
   0x2   :  { %s26_s19 = sshll.u32 %s903_s18, 4  ;;  %s27_s19 = int_to_ptr.vmem [resolvable:$true] %s26_s19 }
   0x3   :  { %s867_s20 = scalar_lea.vmem %s27_s19, 128  ;;  %p872_p1 = scmp.lt.s32.totalorder %s27_s19, %s27_s19 }
   0x4   :  { %p868_p0 = scmp.ne.s32.totalorder %s27_s19, %s867_s20  ;;  %p873_p2 = scmp.lt.s32.totalorder %s867_s20, %s867_s20 }
   0x6   :  { %p874_p3 = por %p873_p2, %p872_p1 }
   0x8   :  { %p875_p4 = pnand %p874_p3, %p868_p0 }
   0xa   :  { %878 = shalt.err (!%p875_p4)
}
   0xb   :  { %29 = dma.hbm_to_vmem [thread:$0]  %s1122_s4, 128, %s27_s19, [#allocation3]  }
   0xc   :  { %899 = dma.done.wait [#allocation3], 128  }
   0xd   :  { %900 = vsyncadd [#allocation3], 4294967168  ;;  %v904_v0 = vmov 0.0   ;;  %vm905_vm0 = vmmov 0   ;;  %v819_v1 = vld [vmem:[%s1120_s2 + $0x38] sm:$0xff]   ;;  %v820_v2 = vld [vmem:[%s1120_s2 + $0x30] sm:$0xff]   ;;  %v183_v52 = vlaneseq }
   0xe   :  { %734 = vmatprep.subr.bf16.mxu0 %v904_v0  ;;  %750 = vmatprep.mubr.msk.bf16.mxu0 %vm905_vm0, %v904_v0  ;;  %v821_v3 = vld [vmem:[%s1120_s2 + $0x28] sm:$0xff]   ;;  %v822_v4 = vld [vmem:[%s1120_s2 + $0x20] sm:$0xff]   ;;  %v823_v5 = vld [vmem:[%s1120_s2 + $0x18] sm:$0xff]   ;;  %vm283_vm1 = vcmask 130048   ;;  %s907_s9 = smov [#allocation5]   ;;  %vm617_vm2 = vcmask 261248  }
   0xf   :  { %754 = vmatprep.subr.bf16.mxu1 %v904_v0  ;;  %770 = vmatprep.mubr.msk.bf16.mxu1 %vm905_vm0, %v904_v0  ;;  %v824_v6 = vld [vmem:[%s1120_s2 + $0x10] sm:$0xff]   ;;  %v825_v7 = vld [vmem:[%s1120_s2 + $0x8] sm:$0xff]   ;;  %v826_v8 = vld [vmem:[%s1120_s2] sm:$0xff]   ;;  %v1052_v54 = vshrl.u32 %v183_v52, 7 }
  0x10   :  { %735 = vmatpush3.bf16.msra.mxu0 %v819_v1  ;;  %v35_v9 = vld [vmem:[%s1118_s0] sm:$0xff]  ;;  %v827_v11 = vld [vmem:[%s1120_s2 + $0x78] sm:$0xff]   ;;  %v828_v12 = vld [vmem:[%s1120_s2 + $0x70] sm:$0xff]  }
  0x11   :  { %736 = vmatprep.subr.bf16.mxu0 %v904_v0  ;;  %v68_v10 = vpack.c.bf16 %v35_v9, %v35_v9  ;;  %v829_v13 = vld [vmem:[%s1120_s2 + $0x68] sm:$0xff]   ;;  %v830_v14 = vld [vmem:[%s1120_s2 + $0x60] sm:$0xff]   ;;  %v831_v15 = vld [vmem:[%s1120_s2 + $0x58] sm:$0xff]   ;;  %v185_v1 = vsub.s32 0, %v1052_v54 }
  0x12   :  { %v832_v16 = vld [vmem:[%s1120_s2 + $0x50] sm:$0xff]   ;;  %v833_v17 = vld [vmem:[%s1120_s2 + $0x48] sm:$0xff]   ;;  %v834_v18 = vld [vmem:[%s1120_s2 + $0x40] sm:$0xff]  }
  0x13   :  { %v323_v19 = vld [vmem:[%s1119_s1] sm:$0xff]  ;;  %v835_v21 = vld [vmem:[%s1121_s3 + $0x38] sm:$0xff]   ;;  %v836_v22 = vld [vmem:[%s1121_s3 + $0x30] sm:$0xff]   ;;  %s625_s1 = sshll.u32 %s907_s9, 4  ;;  %s626_s1 = int_to_ptr.vmem [resolvable:$true] %s625_s1 }
  0x14   :  { %737 = vmatpush3.bf16.msra.mxu0 %v820_v2  ;;  %v358_v20 = vpack.c.bf16 %v323_v19, %v323_v19  ;;  %755 = vmatpush3.bf16.msra.mxu1 %v835_v21  ;;  %v837_v23 = vld [vmem:[%s1121_s3 + $0x28] sm:$0xff]   ;;  %v838_v24 = vld [vmem:[%s1121_s3 + $0x20] sm:$0xff]   ;;  %v839_v25 = vld [vmem:[%s1121_s3 + $0x18] sm:$0xff]   ;;  %s879_s2 = scalar_lea.vmem %s626_s1, 128  ;;  %p884_p6 = scmp.lt.s32.totalorder %s626_s1, %s626_s1 }
  0x15   :  { %738 = vmatprep.subr.bf16.mxu0 %v904_v0  ;;  %756 = vmatprep.subr.bf16.mxu1 %v904_v0  ;;  %v840_v26 = vld [vmem:[%s1121_s3 + $0x10] sm:$0xff]   ;;  %v841_v27 = vld [vmem:[%s1121_s3 + $0x8] sm:$0xff]   ;;  %v842_v28 = vld [vmem:[%s1121_s3] sm:$0xff]   ;;  %p880_p5 = scmp.ne.s32.totalorder %s626_s1, %s879_s2  ;;  %p885_p7 = scmp.lt.s32.totalorder %s879_s2, %s879_s2 }
  0x16   :  { %v1057_v57 = vld [vmem:[#allocation2] sm:$0xff] }
  0x17   :  { %p886_p8 = por %p885_p7, %p884_p6 }
  0x18   :  { %739 = vmatpush3.bf16.msra.mxu0 %v821_v3  ;;  %757 = vmatpush3.bf16.msra.mxu1 %v836_v22 }
  0x19   :  { %740 = vmatprep.subr.bf16.mxu0 %v904_v0  ;;  %758 = vmatprep.subr.bf16.mxu1 %v904_v0  ;;  %p887_p9 = pnand %p886_p8, %p880_p5 }
  0x1c   :  { %741 = vmatpush3.bf16.msra.mxu0 %v822_v4  ;;  %759 = vmatpush3.bf16.msra.mxu1 %v837_v23 }
  0x1d   :  { %742 = vmatprep.subr.bf16.mxu0 %v904_v0  ;;  %760 = vmatprep.subr.bf16.mxu1 %v904_v0 }
  0x20   :  { %743 = vmatpush3.bf16.msra.mxu0 %v823_v5  ;;  %761 = vmatpush3.bf16.msra.mxu1 %v838_v24 }
  0x21   :  { %744 = vmatprep.subr.bf16.mxu0 %v904_v0  ;;  %762 = vmatprep.subr.bf16.mxu1 %v904_v0 }
  0x24   :  { %745 = vmatpush3.bf16.msra.mxu0 %v824_v6  ;;  %763 = vmatpush3.bf16.msra.mxu1 %v839_v25  ;;  %v843_v25 = vld [vmem:[%s1121_s3 + $0x78] sm:$0xff]  }
  0x25   :  { %746 = vmatprep.subr.bf16.mxu0 %v904_v0  ;;  %764 = vmatprep.subr.bf16.mxu1 %v904_v0 }
  0x28   :  { %747 = vmatpush3.bf16.msra.mxu0 %v825_v7  ;;  %765 = vmatpush3.bf16.msra.mxu1 %v840_v26 }
  0x29   :  { %748 = vmatprep.subr.bf16.mxu0 %v904_v0  ;;  %766 = vmatprep.subr.bf16.mxu1 %v904_v0 }
  0x2c   :  { %749 = vmatpush3.bf16.msra.mxu0 %v826_v8  ;;  %767 = vmatpush3.bf16.msra.mxu1 %v841_v27  ;;  %v190_v8 = vsub.s32 1, %v1052_v54 }
  0x2d   :  { %774 = vmatprep.subr.bf16.mxu0 %v904_v0  ;;  %768 = vmatprep.subr.bf16.mxu1 %v904_v0 }
  0x2f   :  { %751 = vmatmul.mubr.bf16.vlgmr.msra.gmra.mxu0 %v68_v10 }
  0x30   :  { %775 = vmatpush3.bf16.msra.mxu0 %v827_v11  ;;  %790 = vmatprep.mubr.msk.bf16.mxu0 %vm905_vm0, %v904_v0 }
  0x31   :  { %776 = vmatprep.subr.bf16.mxu0 %v904_v0  ;;  %769 = vmatpush3.bf16.msra.mxu1 %v842_v28 }
  0x32   :  { %794 = vmatprep.subr.bf16.mxu1 %v904_v0 }
  0x34   :  { %777 = vmatpush3.bf16.msra.mxu0 %v828_v12 }
  0x35   :  { %778 = vmatprep.subr.bf16.mxu0 %v904_v0 }
  0x38   :  { %779 = vmatpush3.bf16.msra.mxu0 %v829_v13 }
  0x39   :  { %780 = vmatprep.subr.bf16.mxu0 %v904_v0 }
  0x3c   :  { %781 = vmatpush3.bf16.msra.mxu0 %v830_v14 }
  0x3d   :  { %782 = vmatprep.subr.bf16.mxu0 %v904_v0 }
  0x40   :  { %783 = vmatpush3.bf16.msra.mxu0 %v831_v15 }
  0x41   :  { %784 = vmatprep.subr.bf16.mxu0 %v904_v0 }
  0x44   :  { %785 = vmatpush3.bf16.msra.mxu0 %v832_v16 }
  0x45   :  { %786 = vmatprep.subr.bf16.mxu0 %v904_v0 }
  0x48   :  { %787 = vmatpush3.bf16.msra.mxu0 %v833_v17 }
  0x49   :  { %788 = vmatprep.subr.bf16.mxu0 %v904_v0 }
  0x4c   :  { %789 = vmatpush3.bf16.msra.mxu0 %v834_v18 }
  0x4f   :  { %791 = vmatmul.mubr.bf16.vlgmr.msra.gmra.mxu0 %v358_v20 }
  0xef   :  { %v151_v29 = vpop.f32.mrf.mxu0 }
  0xf0   :  { %v157_v30 = vrot.slane %v151_v29, 4  ;;  %v164_v31 = vmul.f32 %v151_v29, %v151_v29 }
  0xf1   :  { %v752_v32 = vpop.f32.mrf.mxu0 }
  0xf2   :  { %v158_v33 = vadd.f32 %v157_v30, %v151_v29  ;;  %v165_v34 = vrot.slane %v164_v31, 4  ;;  %v845_v30 = vld [vmem:[%s1121_s3 + $0x68] sm:$0xff]   ;;  %v847_v32 = vld [vmem:[%s1121_s3 + $0x58] sm:$0xff]  }
  0xf3   :  { %v154_v35 = vpop.f32.mrf.mxu0 }
  0xf4   :  { %v159_v36 = vrot.slane %v158_v33, 2  ;;  %v166_v37 = vadd.f32 %v165_v34, %v164_v31  ;;  %v846_v31 = vld [vmem:[%s1121_s3 + $0x60] sm:$0xff]   ;;  %v475_v35 = vsub.s32 4, %v1052_v54 }
  0xf5   :  { %v753_v38 = vpop.f32.mrf.mxu0 }
  0xf6   :  { %v160_v39 = vadd.f32 %v159_v36, %v158_v33  ;;  %v167_v40 = vrot.slane %v166_v37, 2  ;;  %v848_v36 = vld [vmem:[%s1121_s3 + $0x50] sm:$0xff]  }
  0xf8   :  { %v161_v41 = vrot.slane %v160_v39, 1  ;;  %v168_v42 = vadd.f32 %v167_v40, %v166_v37  ;;  %v480_v40 = vsub.s32 5, %v1052_v54 }
  0xfa   :  { %v162_v43 = vadd.f32 %v161_v41, %v160_v39  ;;  %v169_v44 = vrot.slane %v168_v42, 1  ;;  %v849_v41 = vld [vmem:[%s1121_s3 + $0x48] sm:$0xff]  }
  0xfc   :  { %v163_v45 = vmul.f32 0.125, %v162_v43  ;;  %v170_v46 = vadd.f32 %v169_v44, %v168_v42 }
  0xfe   :  { %v171_v47 = vmul.f32 0.125, %v170_v46  ;;  %v172_v48 = vmul.f32 %v163_v45, %v163_v45 }
 0x100   :  { %v173_v49 = vsub.f32 %v171_v47, %v172_v48 }
 0x102   :  { %v174_v50 = vmax.f32 %v173_v49, 0.0 }
 0x104   :  { %v175_v51 = vadd.f32 1e-05, %v174_v50 }
 0x106   :  { %851 = vrsqrt.f32 %v175_v51 }
 0x10f   :  { %v1050_v53 = vpop.f32.mrf.mxu0 }
 0x110   :  { %v447_v55 = vrot.slane %v1050_v53, 4  ;;  %v454_v56 = vmul.f32 %v1050_v53, %v1050_v53 }
 0x111   :  { %v792_v58 = vpop.f32.mrf.mxu0 }
 0x112   :  { %v448_v59 = vadd.f32 %v447_v55, %v1050_v53  ;;  %v455_v60 = vrot.slane %v454_v56, 4 }
 0x113   :  { %v852_v61 = vpop.eup %851  ;;  %v444_v62 = vpop.f32.mrf.mxu0 }
 0x114   :  { %v177_v63 = vmul.f32 %v852_v61, %v1057_v57  ;;  %v449_v2 = vrot.slane %v448_v59, 2  ;;  %v456_v3 = vadd.f32 %v455_v60, %v454_v56 }
 0x115   :  { %v793_v4 = vpop.f32.mrf.mxu0 }
 0x116   :  { %v450_v5 = vadd.f32 %v449_v2, %v448_v59  ;;  %v457_v6 = vrot.slane %v456_v3, 2  ;;  %v178_v7 = vmul.f32 %v177_v63, %v163_v45  ;;  %v186_v9 = vrot.slane %v177_v63, %v185_v1  ;;  %v850_v45 = vld [vmem:[%s1121_s3 + $0x40] sm:$0xff]  }
 0x118   :  { %v451_v10 = vrot.slane %v450_v5, 1  ;;  %v458_v11 = vadd.f32 %v457_v6, %v456_v3  ;;  %v180_v12 = vrot.slane %v178_v7, 7  ;;  %v187_v16 = vmul.f32 %v186_v9, %v151_v29  ;;  %v844_v29 = vld [vmem:[%s1121_s3 + $0x70] sm:$0xff]   ;;  %s906_s3 = smov 16  }
 0x11a   :  { %v452_v13 = vadd.f32 %v451_v10, %v450_v5  ;;  %v459_v14 = vrot.slane %v458_v11, 1  ;;  %v182_v15 = vsub.f32 %v1057_v57, %v180_v12 }
 0x11c   :  { %v453_v17 = vmul.f32 0.125, %v452_v13  ;;  %v460_v18 = vadd.f32 %v459_v14, %v458_v11  ;;  %v191_v19 = vrot.slane %v182_v15, %v190_v8 }
 0x11e   :  { %v461_v20 = vmul.f32 0.125, %v460_v18  ;;  %v462_v21 = vmul.f32 %v453_v17, %v453_v17  ;;  %v192_v22 = vadd.f32 %v191_v19, %v187_v16 }
 0x120   :  { %v463_v23 = vsub.f32 %v461_v20, %v462_v21  ;;  %v193_v24 = vmax.f32 %v192_v22, 0.0 }
 0x122   :  { %v464_v26 = vmax.f32 %v463_v23, 0.0  ;;  %v194_v27 = vpack.c.bf16 %v193_v24, %v193_v24  ;;  %v314_v23 = vsub.s32 2, %v1052_v54 }
 0x124   :  { %v465_v28 = vadd.f32 1e-05, %v464_v26  ;;  %771 = vmatmul.mubr.bf16.vlgmr.msra.gmra.mxu1 %v194_v27 }
 0x125   :  { %795 = vmatpush3.bf16.msra.mxu1 %v843_v25  ;;  %810 = vmatprep.mubr.msk.bf16.mxu1 %vm905_vm0, %v904_v0 }
 0x126   :  { %853 = vrsqrt.f32 %v465_v28  ;;  %796 = vmatprep.subr.bf16.mxu1 %v904_v0 }
 0x129   :  { %797 = vmatpush3.bf16.msra.mxu1 %v844_v29 }
 0x12a   :  { %798 = vmatprep.subr.bf16.mxu1 %v904_v0 }
 0x12d   :  { %799 = vmatpush3.bf16.msra.mxu1 %v845_v30  ;;  %v319_v30 = vsub.s32 3, %v1052_v54 }
 0x12e   :  { %800 = vmatprep.subr.bf16.mxu1 %v904_v0 }
 0x131   :  { %801 = vmatpush3.bf16.msra.mxu1 %v846_v31 }
 0x132   :  { %802 = vmatprep.subr.bf16.mxu1 %v904_v0 }
 0x133   :  { %v854_v33 = vpop.eup %853 }
 0x134   :  { %v467_v34 = vmul.f32 %v854_v33, %v1057_v57 }
 0x135   :  { %803 = vmatpush3.bf16.msra.mxu1 %v847_v32 }
 0x136   :  { %v468_v37 = vmul.f32 %v467_v34, %v453_v17  ;;  %804 = vmatprep.subr.bf16.mxu1 %v904_v0  ;;  %v476_v39 = vrot.slane %v467_v34, %v475_v35 }
 0x138   :  { %v470_v38 = vrot.slane %v468_v37, 7  ;;  %v477_v43 = vmul.f32 %v476_v39, %v1050_v53 }
 0x139   :  { %805 = vmatpush3.bf16.msra.mxu1 %v848_v36 }
 0x13a   :  { %v472_v42 = vsub.f32 %v1057_v57, %v470_v38  ;;  %806 = vmatprep.subr.bf16.mxu1 %v904_v0 }
 0x13c   :  { %v481_v44 = vrot.slane %v472_v42, %v480_v40 }
 0x13d   :  { %807 = vmatpush3.bf16.msra.mxu1 %v849_v41 }
 0x13e   :  { %v482_v46 = vadd.f32 %v481_v44, %v477_v43  ;;  %808 = vmatprep.subr.bf16.mxu1 %v904_v0 }
 0x140   :  { %v483_v47 = vmax.f32 %v482_v46, 0.0 }
 0x141   :  { %809 = vmatpush3.bf16.msra.mxu1 %v850_v45 }
 0x142   :  { %v484_v48 = vpack.c.bf16 %v483_v47, %v483_v47 }
 0x144   :  { %811 = vmatmul.mubr.bf16.vlgmr.msra.gmra.mxu1 %v484_v48 }
 0x1e4   :  { %v277_v49 = vpop.f32.mrf.mxu1 }
 0x1e5   :  { %v284_v50 = vsel %vm283_vm1, %v277_v49, 0.0  ;;  %v292_v51 = vmul.f32 %v277_v49, %v277_v49 }
 0x1e6   :  { %v285_v52 = vrot.slane %v284_v50, 4  ;;  %v772_v53 = vpop.f32.mrf.mxu1 }
 0x1e7   :  { %v293_v55 = vsel %vm283_vm1, %v292_v51, 0.0 }
 0x1e8   :  { %v286_v56 = vadd.f32 %v285_v52, %v284_v50  ;;  %v294_v58 = vrot.slane %v293_v55, 4  ;;  %v280_v59 = vpop.f32.mrf.mxu1  ;;  %v603_v52 = vsub.s32 6, %v1052_v54 }
 0x1ea   :  { %v287_v60 = vrot.slane %v286_v56, 2  ;;  %v295_v61 = vadd.f32 %v294_v58, %v293_v55  ;;  %v773_v62 = vpop.f32.mrf.mxu1 }
 0x1ec   :  { %v288_v0 = vadd.f32 %v287_v60, %v286_v56  ;;  %v296_v63 = vrot.slane %v295_v61, 2  ;;  %v608_v56 = vsub.s32 7, %v1052_v54 }
 0x1ee   :  { %v289_v1 = vrot.slane %v288_v0, 1  ;;  %v297_v2 = vadd.f32 %v296_v63, %v295_v61 }
 0x1f0   :  { %v290_v3 = vadd.f32 %v289_v1, %v288_v0  ;;  %v298_v4 = vrot.slane %v297_v2, 1 }
 0x1f2   :  { %v291_v5 = vmul.f32 0.125, %v290_v3  ;;  %v299_v6 = vadd.f32 %v298_v4, %v297_v2 }
 0x1f4   :  { %v300_v7 = vmul.f32 0.125, %v299_v6  ;;  %v301_v8 = vmul.f32 %v291_v5, %v291_v5 }
 0x1f6   :  { %v302_v9 = vsub.f32 %v300_v7, %v301_v8 }
 0x1f8   :  { %v303_v10 = vmax.f32 %v302_v9, 0.0 }
 0x1fa   :  { %v304_v11 = vadd.f32 1e-05, %v303_v10 }
 0x1fc   :  { %855 = vrsqrt.f32 %v304_v11 }
 0x204   :  { %v567_v12 = vpop.f32.mrf.mxu1 }
 0x205   :  { %v573_v13 = vsel %vm283_vm1, %v567_v12, 0.0  ;;  %v581_v14 = vmul.f32 %v567_v12, %v567_v12 }
 0x206   :  { %v574_v15 = vrot.slane %v573_v13, 4  ;;  %v812_v16 = vpop.f32.mrf.mxu1 }
 0x207   :  { %v582_v17 = vsel %vm283_vm1, %v581_v14, 0.0 }
 0x208   :  { %v575_v18 = vadd.f32 %v574_v15, %v573_v13  ;;  %v583_v19 = vrot.slane %v582_v17, 4  ;;  %v570_v20 = vpop.f32.mrf.mxu1 }
 0x209   :  { %v856_v21 = vpop.eup %855 }
 0x20a   :  { %v306_v22 = vmul.f32 %v856_v21, %v1057_v57  ;;  %v576_v24 = vrot.slane %v575_v18, 2  ;;  %v584_v25 = vadd.f32 %v583_v19, %v582_v17  ;;  %v813_v26 = vpop.f32.mrf.mxu1 }
 0x20c   :  { %v307_v27 = vmul.f32 %v306_v22, %v291_v5  ;;  %v577_v28 = vadd.f32 %v576_v24, %v575_v18  ;;  %v585_v29 = vrot.slane %v584_v25, 2  ;;  %v315_v32 = vrot.slane %v306_v22, %v314_v23 }
 0x20e   :  { %v309_v31 = vrot.slane %v307_v27, 7  ;;  %v578_v33 = vrot.slane %v577_v28, 1  ;;  %v586_v34 = vadd.f32 %v585_v29, %v584_v25  ;;  %v316_v38 = vmul.f32 %v315_v32, %v277_v49 }
 0x210   :  { %v311_v35 = vsub.f32 %v1057_v57, %v309_v31  ;;  %v579_v36 = vadd.f32 %v578_v33, %v577_v28  ;;  %v587_v37 = vrot.slane %v586_v34, 1 }
 0x212   :  { %v320_v39 = vrot.slane %v311_v35, %v319_v30  ;;  %v580_v40 = vmul.f32 0.125, %v579_v36  ;;  %v588_v41 = vadd.f32 %v587_v37, %v586_v34 }
 0x214   :  { %v321_v42 = vadd.f32 %v320_v39, %v316_v38  ;;  %v589_v43 = vmul.f32 0.125, %v588_v41  ;;  %v590_v44 = vmul.f32 %v580_v40, %v580_v40 }
 0x216   :  { %v322_v45 = vmax.f32 %v321_v42, 0.0  ;;  %v591_v46 = vsub.f32 %v589_v43, %v590_v44 }
 0x218   :  { %612 = vst.msk [vmem:[#allocation5] sm:$0xff] %vm283_vm1, %v322_v45  ;;  %v592_v47 = vmax.f32 %v591_v46, 0.0 }
 0x21a   :  { %v593_v48 = vadd.f32 1e-05, %v592_v47 }
 0x21c   :  { %857 = vrsqrt.f32 %v593_v48 }
 0x229   :  { %v858_v50 = vpop.eup %857 }
 0x22a   :  { %v595_v51 = vmul.f32 %v858_v50, %v1057_v57 }
 0x22c   :  { %v596_v53 = vmul.f32 %v595_v51, %v580_v40  ;;  %v604_v49 = vrot.slane %v595_v51, %v603_v52 }
 0x22e   :  { %v598_v55 = vrot.slane %v596_v53, 7  ;;  %v605_v59 = vmul.f32 %v604_v49, %v567_v12 }
 0x230   :  { %v600_v58 = vsub.f32 %v1057_v57, %v598_v55 }
 0x232   :  { %v609_v60 = vrot.slane %v600_v58, %v608_v56 }
 0x234   :  { %v610_v61 = vadd.f32 %v609_v60, %v605_v59 }
 0x236   :  { %v611_v62 = vmax.f32 %v610_v61, 0.0 }
 0x238   :  { %614 = vrot.lane.b32.xlu0 %v611_v62, %s906_s3 }
 0x2aa   :  { %v615_v0 = vpop.permute.xlu0 %614 }
 0x2ab   :  { %618 = vst.msk [vmem:[#allocation5] sm:$0xff] %vm617_vm2, %v615_v0 }
 0x2ac   :  { %890 = shalt.err (!%p887_p9)
}
 0x2ad   :  { %628 = dma.vmem_to_hbm [thread:$0]  %s626_s1, 128, %s1123_s5, [#allocation4]  }
 0x2ae   :  { %901 = dma.done.wait [#allocation4], 128  }
 0x2af   :  { %902 = vsyncadd [#allocation4], 4294967168 }
 0x2b0   :  { %632 = vsyncpa [#allocation3], 1 }
 0x2b1   :  { %633 = vsyncpa [#allocation4], 1 }

</bundles_post_ra>
